<compile_context>
chip_gen: v7x
topology: tpu7x:2x2x1
jax: 0.10.0
libtpu: 0.0.40
codegen_flags: <defaults>
</compile_context>

<pallas_src>
import functools

import jax
import jax.numpy as jnp
from jax.experimental import pallas as pl
from jax.experimental.pallas import tpu as pltpu


def _round_up(x: int, m: int) -> int:
    return ((x + m - 1) // m) * m


def _fused_mlp_kernel(x_ref, *refs):
    """Fused MLP on one batch tile, entirely in VMEM/vregs.

    refs = (w1, b1, w2, b2, ..., wL, bL, o_ref)
      x_ref : (tm, K)            input tile (K = full, unpadded fan-in)
      w_i   : (K_i, N_i_pad)     bf16, transposed to (in, out); hidden fan-in
                                 and all fan-out dims zero-padded to 128
      b_i   : (1, N_i_pad)       fp32
      o_ref : (tm, N_last_pad)   lane-dense (multiple of 128), fp32
    """
    o_ref = refs[-1]
    param_refs = refs[:-1]
    n_layers = len(param_refs) // 2

    y = x_ref[...].astype(jnp.float32)
    for i in range(n_layers):
        w = param_refs[2 * i][...]        # bf16 (Kin, Nout)
        b = param_refs[2 * i + 1][...]    # fp32 (1, Nout)
        # bf16 x bf16 -> fp32 accumulate on the MXU; elementwise stays fp32.
        y = jnp.dot(y.astype(jnp.bfloat16), w,
                    preferred_element_type=jnp.float32) + b
        if i < n_layers - 1:              # ReLU on all but the last layer
            y = jnp.maximum(y, 0.0)
    o_ref[...] = y.astype(o_ref.dtype)


@functools.partial(jax.jit, static_argnames=("out_dim", "tm_max"))
def _mlp_forward(x, padded_params, *, out_dim: int, tm_max: int = 512):
    """x: (M, K). padded_params: list of (w_bf16 (Kin, Np), b_f32 (1, Np))."""
    M, K = x.shape
    Np_last = padded_params[-1][0].shape[1]      # padded output features

    # Batch tiling: one tile for small batches, <= tm_max rows per step.
    # For larger M keep >= 2 grid steps so both v7x TensorCores get work.
    tm = min(_round_up(M, 8), tm_max)
    if M > 256:
        tm = min(tm, _round_up(-(-M // 2), 8))
    grid_m = pl.cdiv(M, tm)                      # partial last block: no pad

    in_specs = [pl.BlockSpec((tm, K), lambda i: (i, 0))]
    flat_params = []
    for w, b in padded_params:
        kin, kout = w.shape
        # Grid-invariant weights/biases -> single-buffered (no re-fetch).
        in_specs.append(pl.BlockSpec((kin, kout), lambda i: (0, 0),
                                     pipeline_mode=pl.Buffered(1)))
        in_specs.append(pl.BlockSpec((1, kout), lambda i: (0, 0),
                                     pipeline_mode=pl.Buffered(1)))
        flat_params += [w, b]

    # VMEM budget: double-buffered x/out tiles + single-buffered weights
    # + fp32 intermediate activations, with headroom.  Capped at 64 MiB
    # (v7x physical VMEM) so the same config compiles on all generations.
    itemsize_x = x.dtype.itemsize
    bytes_w = sum(w.size * w.dtype.itemsize + b.size * b.dtype.itemsize
                  for w, b in padded_params)
    max_width = max(w.shape[1] for w, _ in padded_params)
    vmem_need = (2 * tm * K * itemsize_x          # input tile (double buffer)
                 + bytes_w                        # weights/biases (single)
                 + 2 * tm * Np_last * 4           # output tile (double buffer)
                 + 2 * tm * max_width * 4)        # fp32 intermediates
    vmem_limit = min(int(1.5 * vmem_need) + (8 << 20), 64 << 20)

    flops = 2 * M * sum(w.shape[0] * w.shape[1] for w, _ in padded_params)
    bytes_accessed = M * K * itemsize_x + bytes_w + M * Np_last * 4

    out = pl.pallas_call(
        _fused_mlp_kernel,
        out_shape=jax.ShapeDtypeStruct((M, Np_last), jnp.float32),
        grid=(grid_m,),
        in_specs=in_specs,
        out_specs=pl.BlockSpec((tm, Np_last), lambda i: (i, 0)),
        compiler_params=pltpu.CompilerParams(
            dimension_semantics=("parallel",),
            vmem_limit_bytes=vmem_limit),
        cost_estimate=pl.CostEstimate(flops=flops, transcendentals=0,
                                      bytes_accessed=bytes_accessed),
    )(x, *flat_params)

    # Drop lane padding of the final layer (rows are already exact: no M pad).
    return out[:, :out_dim]


class MLPModulePallas:
    """JAX/Pallas equivalent of the PyTorch MLPModule (ReLU activation)."""

    def __init__(self, input_dim, hidden_dim, output_dim, num_layers=2,
                 key=jax.random.PRNGKey(0)):
        dims = [input_dim] + [hidden_dim] * (num_layers - 1) + [output_dim]
        self.output_dim = output_dim

        # PyTorch-layout fp32 params (reference / checkpoint layout) ...
        self.params = []
        for i in range(num_layers):
            fan_in, fan_out = dims[i], dims[i + 1]
            key, kw, kb = jax.random.split(key, 3)
            bound = 1.0 / (fan_in ** 0.5)
            # nn.Linear default init: U(-1/sqrt(fan_in), 1/sqrt(fan_in))
            w = jax.random.uniform(kw, (fan_out, fan_in), jnp.float32,
                                   -bound, bound)
            b = jax.random.uniform(kb, (fan_out,), jnp.float32, -bound, bound)
            self.params.append((w, b))

        # ... and kernel-layout params, built ONCE here:
        #   * transposed to (in, out)
        #   * weights cast to bf16
        #   * fan-out (and hidden fan-in) zero-padded to multiples of 128;
        #     the FIRST layer's fan-in is left unpadded (full-K block).
        self.padded_params = []
        for idx, (w, b) in enumerate(self.params):
            fan_out, fan_in = w.shape
            kin = fan_in if idx == 0 else _round_up(fan_in, 128)
            np_ = _round_up(fan_out, 128)
            w_t = (jnp.zeros((kin, np_), jnp.bfloat16)
                   .at[:fan_in, :fan_out].set(w.T.astype(jnp.bfloat16)))
            b_p = jnp.zeros((1, np_), jnp.float32).at[0, :fan_out].set(b)
            self.padded_params.append((w_t, b_p))

    def __call__(self, x):
        return _mlp_forward(x, self.padded_params, out_dim=self.output_dim)


def mlp_ref(params, x, dot_dtype=jnp.float32):
    """Pure-JAX reference (PyTorch-layout params). dot_dtype=bfloat16 mirrors
    the kernel's numerics (bf16 dot inputs, fp32 accumulate/elementwise)."""
    for w, b in params[:-1]:
        x = jnp.maximum(
            jnp.dot(x.astype(dot_dtype), w.T.astype(dot_dtype),
                    preferred_element_type=jnp.float32) + b, 0.0)
    w, b = params[-1]
    return jnp.dot(x.astype(dot_dtype), w.T.astype(dot_dtype),
                   preferred_element_type=jnp.float32) + b


if __name__ == "__main__":
    # Small shapes consistent with the module's forward: (batch, input_dim).
    batch, input_dim, hidden_dim, output_dim = 16, 128, 64, 8

    key = jax.random.PRNGKey(0)
    kx, kp = jax.random.split(key)
    x = jax.random.normal(kx, (batch, input_dim), jnp.float32)

    model = MLPModulePallas(input_dim, hidden_dim, output_dim,
                            num_layers=2, key=kp)

    out = model(x)
    out = jax.block_until_ready(out)
    assert out.shape == (batch, output_dim)

    # Tight check vs a reference that mirrors the kernel numerics (bf16 dots).
    ref_bf16 = mlp_ref(model.params, x, dot_dtype=jnp.bfloat16)
    assert jnp.allclose(out, ref_bf16, atol=2e-3, rtol=2e-3), \
        "mismatch vs bf16-dot reference"

    # Loose check vs the exact fp32 reference (bf16 weight quantization).
    ref_f32 = mlp_ref(model.params, x)
    assert jnp.allclose(out, ref_f32, atol=6e-2, rtol=6e-2), \
        "mismatch vs fp32 reference"

    print("KERNEL_OK")
</pallas_src>

<mosaic_0001>
module attributes {stable_mosaic.version = 11 : i64} {
  func.func @_fused_mlp_kernel(%arg0: i32, %arg1: memref<16x128xf32, #tpu.memory_space<vmem>>, %arg2: memref<128x128xbf16, #tpu.memory_space<vmem>>, %arg3: memref<1x128xf32, #tpu.memory_space<vmem>>, %arg4: memref<128x128xbf16, #tpu.memory_space<vmem>>, %arg5: memref<1x128xf32, #tpu.memory_space<vmem>>, %arg6: memref<16x128xf32, #tpu.memory_space<vmem>>) attributes {dimension_semantics = [#tpu.dimension_semantics<parallel>], iteration_bounds = array<i64: 1>, scalar_prefetch = 0 : i64, scratch_operands = 0 : i64, tpu.core_type = #tpu.core_type<tc>, window_params = [{transform_indices = @transform_0, window_bounds = array<i64: 16, 128>}, {pipeline_mode = #tpu.pipeline_mode<synchronous>, transform_indices = @transform_1, window_bounds = array<i64: 128, 128>}, {pipeline_mode = #tpu.pipeline_mode<synchronous>, transform_indices = @transform_2, window_bounds = array<i64: 1, 128>}, {pipeline_mode = #tpu.pipeline_mode<synchronous>, transform_indices = @transform_3, window_bounds = array<i64: 128, 128>}, {pipeline_mode = #tpu.pipeline_mode<synchronous>, transform_indices = @transform_4, window_bounds = array<i64: 1, 128>}, {transform_indices = @transform_5, window_bounds = array<i64: 16, 128>}]} {
    %c0 = arith.constant 0 : index
    %c0_0 = arith.constant 0 : index
    %0 = vector.load %arg1[%c0, %c0_0] : memref<16x128xf32, #tpu.memory_space<vmem>>, vector<16x128xf32>
    %c0_1 = arith.constant 0 : index
    %c0_2 = arith.constant 0 : index
    %1 = vector.load %arg2[%c0_1, %c0_2] : memref<128x128xbf16, #tpu.memory_space<vmem>>, vector<128x128xbf16>
    %c0_3 = arith.constant 0 : index
    %c0_4 = arith.constant 0 : index
    %2 = vector.load %arg3[%c0_3, %c0_4] : memref<1x128xf32, #tpu.memory_space<vmem>>, vector<1x128xf32>
    %3 = arith.truncf %0 : vector<16x128xf32> to vector<16x128xbf16>
    %cst = arith.constant dense<0.000000e+00> : vector<16x128xf32>
    %4 = tpu.matmul %3, %1, %cst {dimension_numbers = #tpu.dot_dimension_numbers<[1], [0], [0], [1], [0, 0, 1, 1], [], []>} : vector<16x128xbf16>, vector<128x128xbf16>, vector<16x128xf32> -> vector<16x128xf32>
    %5 = vector.broadcast %2 : vector<1x128xf32> to vector<16x128xf32>
    %6 = arith.addf %4, %5 : vector<16x128xf32>
    %cst_5 = arith.constant 0.000000e+00 : f32
    %7 = vector.broadcast %cst_5 : f32 to vector<16x128xf32>
    %8 = arith.maximumf %6, %7 : vector<16x128xf32>
    %c0_6 = arith.constant 0 : index
    %c0_7 = arith.constant 0 : index
    %9 = vector.load %arg4[%c0_6, %c0_7] : memref<128x128xbf16, #tpu.memory_space<vmem>>, vector<128x128xbf16>
    %c0_8 = arith.constant 0 : index
    %c0_9 = arith.constant 0 : index
    %10 = vector.load %arg5[%c0_8, %c0_9] : memref<1x128xf32, #tpu.memory_space<vmem>>, vector<1x128xf32>
    %11 = arith.truncf %8 : vector<16x128xf32> to vector<16x128xbf16>
    %cst_10 = arith.constant dense<0.000000e+00> : vector<16x128xf32>
    %12 = tpu.matmul %11, %9, %cst_10 {dimension_numbers = #tpu.dot_dimension_numbers<[1], [0], [0], [1], [0, 0, 1, 1], [], []>} : vector<16x128xbf16>, vector<128x128xbf16>, vector<16x128xf32> -> vector<16x128xf32>
    %13 = vector.broadcast %10 : vector<1x128xf32> to vector<16x128xf32>
    %14 = arith.addf %12, %13 : vector<16x128xf32>
    %c0_11 = arith.constant 0 : index
    %c0_12 = arith.constant 0 : index
    %15 = vector.load %arg6[%c0_11, %c0_12] : memref<16x128xf32, #tpu.memory_space<vmem>>, vector<16x128xf32>
    tpu.vector_store %arg6[%c0_11, %c0_12], %14 {strides = array<i32>} : memref<16x128xf32, #tpu.memory_space<vmem>>, vector<16x128xf32>,
    return
  }
  func.func @transform_0(%arg0: i32) -> (i32, i32) {
    %c0_i32 = arith.constant 0 : i32
    %c0_i32_0 = arith.constant 0 : i32
    return %arg0, %c0_i32 : i32, i32
  }
  func.func @transform_1(%arg0: i32) -> (i32, i32) {
    %c0_i32 = arith.constant 0 : i32
    %c0_i32_0 = arith.constant 0 : i32
    %c0_i32_1 = arith.constant 0 : i32
    return %c0_i32, %c0_i32_0 : i32, i32
  }
  func.func @transform_2(%arg0: i32) -> (i32, i32) {
    %c0_i32 = arith.constant 0 : i32
    %c0_i32_0 = arith.constant 0 : i32
    %c0_i32_1 = arith.constant 0 : i32
    return %c0_i32, %c0_i32_0 : i32, i32
  }
  func.func @transform_3(%arg0: i32) -> (i32, i32) {
    %c0_i32 = arith.constant 0 : i32
    %c0_i32_0 = arith.constant 0 : i32
    %c0_i32_1 = arith.constant 0 : i32
    return %c0_i32, %c0_i32_0 : i32, i32
  }
  func.func @transform_4(%arg0: i32) -> (i32, i32) {
    %c0_i32 = arith.constant 0 : i32
    %c0_i32_0 = arith.constant 0 : i32
    %c0_i32_1 = arith.constant 0 : i32
    return %c0_i32, %c0_i32_0 : i32, i32
  }
  func.func @transform_5(%arg0: i32) -> (i32, i32) {
    %c0_i32 = arith.constant 0 : i32
    %c0_i32_0 = arith.constant 0 : i32
    return %arg0, %c0_i32 : i32, i32
  }
}

</mosaic_0001>

<bundles_post_ra>
// kernel: _mlp_forward.1
= control target key start
LH: loop header
LB: loop body
LE: loop exit
PB: predicated region body
PF: predicated region fallthrough
CT: control target
= control target key end

     0   :  { %10 = vsyncpa [#allocation3], 0  ;;  %s564_s0 = inlined_call_operand.hbm [shape: f32[16,128], index: 0, kind: input, shape index: {}]   ;;  %s565_s1 = inlined_call_operand.hbm [shape: bf16[128,128], index: 1, kind: input, shape index: {}]   ;;  %s566_s2 = inlined_call_operand.vmem [shape: f32[1,128], index: 2, kind: input, shape index: {}]   ;;  %s567_s3 = inlined_call_operand.hbm [shape: bf16[128,128], index: 3, kind: input, shape index: {}]   ;;  %s568_s4 = inlined_call_operand.vmem [shape: f32[1,128], index: 4, kind: input, shape index: {}]   ;;  %s569_s5 = inlined_call_operand.vmem [shape: f32[16,128], index: 5, kind: output, shape index: {}]  }
   0x1   :  { %11 = vsyncpa [#allocation5], 0  ;;  %s471_s18 = smov [#allocation4]   ;;  %s401_s22 = scalar_lea.hbm %s565_s1, 1024 }
   0x2   :  { %s29_s19 = sshll.u32 %s471_s18, 4  ;;  %p402_p0 = scmp.ne.s32.totalorder %s565_s1, %s401_s22  ;;  %s30_s19 = int_to_ptr.vmem [resolvable:$true] %s29_s19 }
   0x3   :  { %p405_p1 = scmp.lt.u32.totalorder %s401_s22, %s565_s1 }
   0x5   :  { %p407_p2 = pnand %p405_p1, %p402_p0 }
   0x7   :  { %410 = shalt.err (!%p407_p2)
}
   0x8   :  { %s411_s27 = scalar_lea.vmem %s30_s19, 1024  ;;  %p416_p4 = scmp.lt.s32.totalorder %s30_s19, %s30_s19 }
   0x9   :  { %p412_p3 = scmp.ne.s32.totalorder %s30_s19, %s411_s27  ;;  %p417_p5 = scmp.lt.s32.totalorder %s411_s27, %s411_s27 }
   0xb   :  { %p418_p6 = por %p417_p5, %p416_p4 }
   0xd   :  { %p419_p7 = pnand %p418_p6, %p412_p3 }
   0xf   :  { %422 = shalt.err (!%p419_p7)
}
  0x10   :  { %s472_s28 = smov 64   ;;  %s473_s29 = smov 4  }
  0x11   :  { %35 = dma.hbm_to_vmem [thread:$0]  %s565_s1, 1024, %s30_s19, [#allocation5], %s472_s28, %s472_s28, %s473_s29  }
  0x12   :  { %s474_s7 = smov [#allocation2]   ;;  %s423_s11 = scalar_lea.hbm %s564_s0, 256 }
  0x13   :  { %s17_s8 = sshll.u32 %s474_s7, 4  ;;  %p424_p8 = scmp.ne.s32.totalorder %s564_s0, %s423_s11  ;;  %s18_s8 = int_to_ptr.vmem [resolvable:$true] %s17_s8 }
  0x14   :  { %p427_p9 = scmp.lt.u32.totalorder %s423_s11, %s564_s0 }
  0x16   :  { %p429_p10 = pnand %p427_p9, %p424_p8 }
  0x18   :  { %432 = shalt.err (!%p429_p10)
}
  0x19   :  { %s433_s16 = scalar_lea.vmem %s18_s8, 256  ;;  %p438_p12 = scmp.lt.s32.totalorder %s18_s8, %s18_s8 }
  0x1a   :  { %p434_p11 = scmp.ne.s32.totalorder %s18_s8, %s433_s16  ;;  %p439_p13 = scmp.lt.s32.totalorder %s433_s16, %s433_s16 }
  0x1c   :  { %p440_p0 = por %p439_p13, %p438_p12 }
  0x1e   :  { %p441_p1 = pnand %p440_p0, %p434_p11 }
  0x20   :  { %444 = shalt.err (!%p441_p1)
}
  0x21   :  { %s475_s1 = smov 128   ;;  %s476_s17 = smov 8  }
  0x22   :  { %23 = dma.hbm_to_vmem [thread:$0]  %s564_s0, 256, %s18_s8, [#allocation3], %s475_s1, %s475_s1, %s476_s17  }
  0x23   :  { %s477_s20 = smov [#allocation6]   ;;  %s445_s24 = scalar_lea.hbm %s567_s3, 1024 }
  0x24   :  { %s43_s21 = sshll.u32 %s477_s20, 4  ;;  %p446_p2 = scmp.ne.s32.totalorder %s567_s3, %s445_s24  ;;  %s44_s21 = int_to_ptr.vmem [resolvable:$true] %s43_s21 }
  0x25   :  { %p449_p3 = scmp.lt.u32.totalorder %s445_s24, %s567_s3 }
  0x27   :  { %p451_p4 = pnand %p449_p3, %p446_p2 }
  0x29   :  { %454 = shalt.err (!%p451_p4)
}
  0x2a   :  { %s455_s6 = scalar_lea.vmem %s44_s21, 1024  ;;  %p460_p6 = scmp.lt.s32.totalorder %s44_s21, %s44_s21 }
  0x2b   :  { %p456_p5 = scmp.ne.s32.totalorder %s44_s21, %s455_s6  ;;  %p461_p7 = scmp.lt.s32.totalorder %s455_s6, %s455_s6 }
  0x2d   :  { %p462_p8 = por %p461_p7, %p460_p6 }
  0x2f   :  { %p463_p9 = pnand %p462_p8, %p456_p5 }
  0x31   :  { %466 = shalt.err (!%p463_p9)
}
  0x32   :  { %49 = dma.hbm_to_vmem [thread:$0]  %s567_s3, 1024, %s44_s21, [#allocation5], %s472_s28, %s472_s28, %s473_s29  }
  0x33   :  { %467 = dma.done.wait [#allocation3], 256  }
  0x34   :  { %468 = vsyncadd [#allocation3], 4294967040 }
  0x35   :  { %469 = dma.done.wait [#allocation5], 2048  }
  0x36   :  { %470 = vsyncadd [#allocation5], 4294965248  ;;  %v478_v0 = vmov 0.0   ;;  %vm479_vm0 = vmmov 0   ;;  %v385_v1 = vld [vmem:[#allocation4] sm:$0xff]   ;;  %v386_v2 = vld [vmem:[#allocation4 + $0x8] sm:$0xff]  }
  0x37   :  { %336 = vmatprep.subr.bf16.mxu0 %v478_v0  ;;  %352 = vmatprep.mubr.msk.bf16.mxu0 %vm479_vm0, %v478_v0  ;;  %v387_v3 = vld [vmem:[#allocation4 + $0x10] sm:$0xff]   ;;  %v393_v4 = vld [vmem:[#allocation6] sm:$0xff]   ;;  %v388_v5 = vld [vmem:[#allocation4 + $0x18] sm:$0xff]  }
  0x38   :  { %356 = vmatprep.subr.bf16.mxu1 %v478_v0  ;;  %372 = vmatprep.mubr.msk.bf16.mxu1 %vm479_vm0, %v478_v0  ;;  %v394_v6 = vld [vmem:[#allocation6 + $0x8] sm:$0xff]   ;;  %v389_v7 = vld [vmem:[#allocation4 + $0x20] sm:$0xff]   ;;  %v395_v8 = vld [vmem:[#allocation6 + $0x10] sm:$0xff]  }
  0x39   :  { %337 = vmatpush3.bf16.msra.mxu0 %v385_v1  ;;  %357 = vmatpush3.bf16.msra.mxu1 %v393_v4  ;;  %v390_v9 = vld [vmem:[#allocation4 + $0x28] sm:$0xff]   ;;  %v396_v10 = vld [vmem:[#allocation6 + $0x18] sm:$0xff]   ;;  %v391_v11 = vld [vmem:[#allocation4 + $0x30] sm:$0xff]  }
  0x3a   :  { %338 = vmatprep.subr.bf16.mxu0 %v478_v0  ;;  %358 = vmatprep.subr.bf16.mxu1 %v478_v0  ;;  %v397_v12 = vld [vmem:[#allocation6 + $0x20] sm:$0xff]   ;;  %v392_v13 = vld [vmem:[#allocation4 + $0x38] sm:$0xff]   ;;  %v62_v14 = vld [vmem:[#allocation2] sm:$0xff] }
  0x3b   :  { %v63_v15 = vld [vmem:[#allocation2 + $0x8] sm:$0xff]  ;;  %v398_v16 = vld [vmem:[#allocation6 + $0x28] sm:$0xff]   ;;  %v399_v18 = vld [vmem:[#allocation6 + $0x30] sm:$0xff]  }
  0x3c   :  { %v81_v17 = vpack.c.bf16 %v63_v15, %v62_v14  ;;  %v400_v19 = vld [vmem:[#allocation6 + $0x38] sm:$0xff]   ;;  %v300_v20 = vld [vmem:[%s566_s2] ss:$0 sm:$0xff] }
  0x3d   :  { %339 = vmatpush3.bf16.msra.mxu0 %v386_v2  ;;  %359 = vmatpush3.bf16.msra.mxu1 %v394_v6  ;;  %v309_v30 = vld [vmem:[%s568_s4] ss:$0 sm:$0xff] }
  0x3e   :  { %340 = vmatprep.subr.bf16.mxu0 %v478_v0  ;;  %360 = vmatprep.subr.bf16.mxu1 %v478_v0 }
  0x41   :  { %341 = vmatpush3.bf16.msra.mxu0 %v387_v3  ;;  %361 = vmatpush3.bf16.msra.mxu1 %v395_v8 }
  0x42   :  { %342 = vmatprep.subr.bf16.mxu0 %v478_v0  ;;  %362 = vmatprep.subr.bf16.mxu1 %v478_v0 }
  0x45   :  { %343 = vmatpush3.bf16.msra.mxu0 %v388_v5  ;;  %363 = vmatpush3.bf16.msra.mxu1 %v396_v10 }
  0x46   :  { %344 = vmatprep.subr.bf16.mxu0 %v478_v0  ;;  %364 = vmatprep.subr.bf16.mxu1 %v478_v0 }
  0x49   :  { %345 = vmatpush3.bf16.msra.mxu0 %v389_v7  ;;  %365 = vmatpush3.bf16.msra.mxu1 %v397_v12 }
  0x4a   :  { %346 = vmatprep.subr.bf16.mxu0 %v478_v0  ;;  %366 = vmatprep.subr.bf16.mxu1 %v478_v0 }
  0x4d   :  { %347 = vmatpush3.bf16.msra.mxu0 %v390_v9  ;;  %367 = vmatpush3.bf16.msra.mxu1 %v398_v16 }
  0x4e   :  { %348 = vmatprep.subr.bf16.mxu0 %v478_v0  ;;  %368 = vmatprep.subr.bf16.mxu1 %v478_v0 }
  0x51   :  { %349 = vmatpush3.bf16.msra.mxu0 %v391_v11  ;;  %369 = vmatpush3.bf16.msra.mxu1 %v399_v18 }
  0x52   :  { %350 = vmatprep.subr.bf16.mxu0 %v478_v0  ;;  %370 = vmatprep.subr.bf16.mxu1 %v478_v0 }
  0x55   :  { %351 = vmatpush3.bf16.msra.mxu0 %v392_v13  ;;  %371 = vmatpush3.bf16.msra.mxu1 %v400_v19 }
  0x58   :  { %353 = vmatmul.mubr.bf16.vlgmr.msra.gmra.mrb[0].mxu0 %v81_v17 }
 0x12b   :  { %v170_v21 = vpop.f32.mrb[0].mxu0 }
 0x12c   :  { %v171_v22 = vadd.f32 %v300_v20, %v170_v21  ;;  %v354_v23 = vpop.f32.mrb[1].mxu0 }
 0x12d   :  { %v173_v24 = vpop.f32.mrb[2].mxu0 }
 0x12e   :  { %v174_v25 = vadd.f32 %v300_v20, %v173_v24  ;;  %v355_v26 = vpop.f32.mrb[3].mxu0  ;;  %v177_v27 = vmax.f32 %v171_v22, 0.0 }
 0x130   :  { %v178_v28 = vmax.f32 %v174_v25, 0.0 }
 0x132   :  { %v196_v29 = vpack.c.bf16 %v178_v28, %v177_v27 }
 0x134   :  { %373 = vmatmul.mubr.bf16.vlgmr.msra.gmra.mrb[0].mxu1 %v196_v29 }
 0x207   :  { %v285_v31 = vpop.f32.mrb[0].mxu1 }
 0x208   :  { %v286_v32 = vadd.f32 %v309_v30, %v285_v31  ;;  %v374_v33 = vpop.f32.mrb[1].mxu1 }
 0x209   :  { %v288_v34 = vpop.f32.mrb[2].mxu1 }
 0x20a   :  { %292 = vst [vmem:[%s569_s5] sm:$0xff] %v286_v32  ;;  %v289_v35 = vadd.f32 %v309_v30, %v288_v34  ;;  %v375_v36 = vpop.f32.mrb[3].mxu1 }
 0x20c   :  { %293 = vst [vmem:[%s569_s5 + $0x8] sm:$0xff] %v289_v35 }
 0x20d   :  { %298 = vsyncpa [#allocation3], 1 }
 0x20e   :  { %299 = vsyncpa [#allocation5], 1 }

</bundles_post_ra>
